<compile_context>
chip_gen: v6e
topology: v6e:2x2x1
jax: 0.10.0
libtpu: 0.0.40
codegen_flags: <defaults>
</compile_context>

<pallas_src>
import functools

import jax
import jax.numpy as jnp
from jax.experimental import pallas as pl
from jax.experimental.pallas import tpu as pltpu


# ----------------------------- Pallas kernel ------------------------------ #

def _gcn_layer_kernel(a_ref, x_ref, w_ref, o_ref, acc_ref, *,
                      activation, n_valid):
    """One (dst-row-tile, src-tile) step of  act(A @ (X @ W))."""
    k = pl.program_id(1)

    @pl.when(k == 0)
    def _():
        acc_ref[...] = jnp.zeros_like(acc_ref)

    # Feature transform for this src tile (bf16 MXU, f32 accumulate) ...
    xw = jnp.dot(x_ref[...], w_ref[...], preferred_element_type=jnp.float32)
    # ... followed by the normalized-adjacency aggregation for this tile pair.
    acc_ref[...] += jnp.dot(a_ref[...], xw.astype(a_ref.dtype),
                            preferred_element_type=jnp.float32)

    @pl.when(k == pl.num_programs(1) - 1)
    def _():
        acc = acc_ref[...]
        if activation == "relu":
            # Dropout(p=0.5, training=False) is the identity.
            o_ref[...] = jnp.maximum(acc, 0.0).astype(o_ref.dtype)
        else:  # "log_softmax" over the first n_valid (= num_classes) columns.
            col = jax.lax.broadcasted_iota(jnp.int32, acc.shape, 1)
            masked = jnp.where(col < n_valid, acc, jnp.float32(-1e30))
            m = jnp.max(masked, axis=1, keepdims=True)
            s = masked - m
            lse = jnp.log(jnp.sum(jnp.exp(s), axis=1, keepdims=True))
            o_ref[...] = (s - lse).astype(o_ref.dtype)


def _round_up(v, m):
    return (v + m - 1) // m * m


def gcn_layer(a, x, w, *, activation, out_dtype, tile_m=256, tile_k=512):
    """act(A @ (X @ W)) with A:[n_dst, n_src], X:[n_src, f_in], W:[f_in, f_out]."""
    n_dst, n_src = a.shape
    f_in = x.shape[1]
    f_out = w.shape[1]

    mp = _round_up(n_dst, tile_m)      # padded dst rows ("parallel" grid axis)
    kp = _round_up(n_src, tile_k)      # padded src rows (reduction grid axis)
    fip = _round_up(f_in, 128)         # lane-dense padded input features
    fop = _round_up(f_out, 128)        # lane-dense padded output features

    # bf16 streaming operands (A dominates HBM traffic); f32 accumulate in-kernel.
    a_p = jnp.zeros((mp, kp), jnp.bfloat16).at[:n_dst, :n_src].set(
        a.astype(jnp.bfloat16))
    x_p = jnp.zeros((kp, fip), jnp.bfloat16).at[:n_src, :f_in].set(
        x.astype(jnp.bfloat16))
    w_p = jnp.zeros((fip, fop), jnp.bfloat16).at[:f_in, :f_out].set(
        w.astype(jnp.bfloat16))

    grid = (mp // tile_m, kp // tile_k)
    kernel = functools.partial(_gcn_layer_kernel,
                               activation=activation, n_valid=f_out)

    out = pl.pallas_call(
        kernel,
        out_shape=jax.ShapeDtypeStruct((mp, fop), out_dtype),
        grid_spec=pltpu.PrefetchScalarGridSpec(
            num_scalar_prefetch=0,
            grid=grid,
            in_specs=[
                pl.BlockSpec((tile_m, tile_k), lambda i, k: (i, k)),  # A tile
                pl.BlockSpec((tile_k, fip), lambda i, k: (k, 0)),     # X tile
                pl.BlockSpec((fip, fop), lambda i, k: (0, 0)),        # W (resident)
            ],
            out_specs=pl.BlockSpec((tile_m, fop), lambda i, k: (i, 0)),
            scratch_shapes=[pltpu.VMEM((tile_m, fop), jnp.float32)],
        ),
        compiler_params=pltpu.CompilerParams(
            dimension_semantics=("parallel", "arbitrary"),
            vmem_limit_bytes=32 * 1024 * 1024,
        ),
    )(a_p, x_p, w_p)

    return out[:n_dst, :f_out]


# ------------------------------- JAX glue ---------------------------------- #

def build_norm_adj(edge_index, edge_weight, n_src, n_dst):
    """Dense normalized bipartite adjacency A[n_dst, n_src] (f32).

    Mirrors PyG gcn_norm with add_remaining_self_loops: existing self-loop
    edges keep their weight, missing self-loops are added with weight 1.0,
    then symmetric normalization deg^{-1/2}[dst] * w * deg^{-1/2}[src].
    """
    # TODO(synk): the dense A build + scatter is O(N_dst*N_src); for large
    # sampled batches replace with a scalar-prefetched CSR gather / weighted
    # segment-sum kernel (PrefetchScalarGridSpec) instead of a dense matmul.
    src = edge_index[0]
    dst = edge_index[1]
    w = edge_weight.astype(jnp.float32)

    # add_remaining_self_loops: keep existing self-loop weights, fill the rest.
    is_self = src == dst
    loop_w = jnp.ones((n_dst,), jnp.float32)
    loop_w = loop_w.at[jnp.where(is_self, dst, n_dst)].set(w, mode="drop")
    w_edges = jnp.where(is_self, jnp.float32(0.0), w)

    loop_idx = jnp.arange(n_dst, dtype=src.dtype)
    all_src = jnp.concatenate([src, loop_idx])
    all_dst = jnp.concatenate([dst, loop_idx])
    all_w = jnp.concatenate([w_edges, loop_w])

    deg = jnp.zeros((n_dst,), jnp.float32).at[all_dst].add(all_w)
    dinv = jnp.where(deg > 0, jax.lax.rsqrt(deg), jnp.float32(0.0))
    # TODO(synk): source nodes outside the target set get deg^{-1/2} = 1.0;
    # verify against GCNConvBatch's bipartite gcn_norm.
    dinv_src = jnp.concatenate(
        [dinv, jnp.ones((n_src - n_dst,), jnp.float32)])
    norm = dinv_src[all_src] * all_w * dinv[all_dst]
    adj = jnp.zeros((n_dst, n_src), jnp.float32).at[all_dst, all_src].add(norm)
    return adj


def glorot(key, shape):
    limit = jnp.sqrt(6.0 / (shape[0] + shape[1]))
    return jax.random.uniform(key, shape, jnp.float32, -limit, limit)


class GCNNetPallas:
    """num_feats -> 16 -> num_classes, bias=False, add_self_loops=True."""

    def __init__(self, num_feats, num_classes, key):
        k1, k2 = jax.random.split(key)
        self.w1 = glorot(k1, (num_feats, 16))
        self.w2 = glorot(k2, (16, num_classes))

    def forward(self, x, adjs, edge_weight):
        # adjs = [(edge_index, e_id, size), ...] as in the PyTorch module.
        (ei1, eid1, size1), (ei2, eid2, size2) = adjs
        a1 = build_norm_adj(ei1, edge_weight[eid1], size1[0], size1[1])
        a2 = build_norm_adj(ei2, edge_weight[eid2], size2[0], size2[1])
        # Layer 1: relu(A1 @ (X @ W1)); eval-mode dropout is identity.
        h1 = gcn_layer(a1, x, self.w1, activation="relu",
                       out_dtype=jnp.bfloat16)
        # Layer 2: log_softmax(A2 @ (H1 @ W2), axis=1).
        return gcn_layer(a2, h1, self.w2, activation="log_softmax",
                         out_dtype=jnp.float32)


def reference_forward(x, a1, w1, a2, w2):
    """Matched-precision (bf16 matmul / f32 accumulate) pure-JAX reference."""
    def bdot(p, q):
        return jnp.dot(p.astype(jnp.bfloat16), q.astype(jnp.bfloat16),
                       preferred_element_type=jnp.float32)
    h1 = jnp.maximum(bdot(a1, bdot(x, w1)), 0.0).astype(jnp.bfloat16)
    h2 = bdot(a2, bdot(h1, w2))
    return jax.nn.log_softmax(h2, axis=1)


# --------------------------------- main ------------------------------------ #

if __name__ == "__main__":
    key = jax.random.PRNGKey(0)
    k_x, k_e1, k_e2, k_w, k_p = jax.random.split(key, 5)

    num_feats, num_classes = 8, 4
    n0, n1, n2 = 32, 16, 8          # source / layer-1 target / layer-2 target
    e1, e2 = 40, 24                 # edges per sampled hop

    x = jax.random.normal(k_x, (n0, num_feats), jnp.float32)

    src1 = jax.random.randint(k_e1, (e1,), 0, n0)
    dst1 = jax.random.randint(jax.random.fold_in(k_e1, 1), (e1,), 0, n1)
    edge_index1 = jnp.stack([src1, dst1])

    src2 = jax.random.randint(k_e2, (e2,), 0, n1)
    dst2 = jax.random.randint(jax.random.fold_in(k_e2, 1), (e2,), 0, n2)
    edge_index2 = jnp.stack([src2, dst2])

    edge_weight = jax.random.uniform(k_w, (e1 + e2,), jnp.float32, 0.1, 1.0)
    e_id1 = jnp.arange(0, e1)
    e_id2 = jnp.arange(e1, e1 + e2)

    adjs = [(edge_index1, e_id1, (n0, n1)),
            (edge_index2, e_id2, (n1, n2))]

    model = GCNNetPallas(num_feats, num_classes, k_p)
    out = model.forward(x, adjs, edge_weight)
    out = jax.block_until_ready(out)

    assert out.shape == (n2, num_classes)
    # Rows of log_softmax must exp-sum to 1.
    assert jnp.allclose(jnp.sum(jnp.exp(out), axis=1), 1.0, atol=1e-4)

    # Matched-precision pure-JAX reference check.
    a1 = build_norm_adj(edge_index1, edge_weight[e_id1], n0, n1)
    a2 = build_norm_adj(edge_index2, edge_weight[e_id2], n1, n2)
    ref = reference_forward(x, a1, model.w1, a2, model.w2)
    assert jnp.allclose(out, ref, atol=2e-2), float(jnp.max(jnp.abs(out - ref)))

    print("KERNEL_OK")
</pallas_src>

<mosaic_0001>
module attributes {stable_mosaic.version = 11 : i64} {
  func.func @_gcn_layer_kernel(%arg0: i32, %arg1: i32, %arg2: memref<256x512xbf16, #tpu.memory_space<vmem>>, %arg3: memref<512x128xbf16, #tpu.memory_space<vmem>>, %arg4: memref<128x128xbf16, #tpu.memory_space<vmem>>, %arg5: memref<256x128xbf16, #tpu.memory_space<vmem>>, %arg6: memref<256x128xf32, #tpu.memory_space<vmem>>) attributes {dimension_semantics = [#tpu.dimension_semantics<parallel>, #tpu.dimension_semantics<arbitrary>], iteration_bounds = array<i64: 1, 1>, scalar_prefetch = 0 : i64, scratch_operands = 1 : i64, tpu.core_type = #tpu.core_type<tc>, window_params = [{transform_indices = @transform_0, window_bounds = array<i64: 256, 512>}, {transform_indices = @transform_1, window_bounds = array<i64: 512, 128>}, {pipeline_mode = #tpu.pipeline_mode<synchronous>, transform_indices = @transform_2, window_bounds = array<i64: 128, 128>}, {transform_indices = @transform_3, window_bounds = array<i64: 256, 128>}]} {
    %c0_i32 = arith.constant 0 : i32
    %0 = arith.cmpi eq, %arg1, %c0_i32 : i32
    %1 = arith.extui %0 : i1 to i32
    %c0_i32_0 = arith.constant 0 : i32
    %2 = arith.cmpi ne, %1, %c0_i32_0 : i32
    scf.if %2 {
      %cst_13 = arith.constant 0.000000e+00 : f32
      %15 = vector.broadcast %cst_13 : f32 to vector<256x128xf32>
      %c0_14 = arith.constant 0 : index
      %c0_15 = arith.constant 0 : index
      %16 = vector.load %arg6[%c0_14, %c0_15] : memref<256x128xf32, #tpu.memory_space<vmem>>, vector<256x128xf32>
      tpu.vector_store %arg6[%c0_14, %c0_15], %15 {strides = array<i32>} : memref<256x128xf32, #tpu.memory_space<vmem>>, vector<256x128xf32>,
    } else {
    }
    %c0 = arith.constant 0 : index
    %c0_1 = arith.constant 0 : index
    %3 = vector.load %arg3[%c0, %c0_1] : memref<512x128xbf16, #tpu.memory_space<vmem>>, vector<512x128xbf16>
    %c0_2 = arith.constant 0 : index
    %c0_3 = arith.constant 0 : index
    %4 = vector.load %arg4[%c0_2, %c0_3] : memref<128x128xbf16, #tpu.memory_space<vmem>>, vector<128x128xbf16>
    %cst = arith.constant dense<0.000000e+00> : vector<512x128xf32>
    %5 = tpu.matmul %3, %4, %cst {dimension_numbers = #tpu.dot_dimension_numbers<[1], [0], [0], [1], [0, 0, 1, 1], [], []>} : vector<512x128xbf16>, vector<128x128xbf16>, vector<512x128xf32> -> vector<512x128xf32>
    %c0_4 = arith.constant 0 : index
    %c0_5 = arith.constant 0 : index
    %6 = vector.load %arg6[%c0_4, %c0_5] : memref<256x128xf32, #tpu.memory_space<vmem>>, vector<256x128xf32>
    %c0_6 = arith.constant 0 : index
    %c0_7 = arith.constant 0 : index
    %7 = vector.load %arg2[%c0_6, %c0_7] : memref<256x512xbf16, #tpu.memory_space<vmem>>, vector<256x512xbf16>
    %8 = arith.truncf %5 : vector<512x128xf32> to vector<512x128xbf16>
    %cst_8 = arith.constant dense<0.000000e+00> : vector<256x128xf32>
    %9 = tpu.matmul %7, %8, %cst_8 {dimension_numbers = #tpu.dot_dimension_numbers<[1], [0], [0], [1], [0, 0, 1, 1], [], []>} : vector<256x512xbf16>, vector<512x128xbf16>, vector<256x128xf32> -> vector<256x128xf32>
    %10 = arith.addf %6, %9 : vector<256x128xf32>
    %c0_9 = arith.constant 0 : index
    %c0_10 = arith.constant 0 : index
    %11 = vector.load %arg6[%c0_9, %c0_10] : memref<256x128xf32, #tpu.memory_space<vmem>>, vector<256x128xf32>
    tpu.vector_store %arg6[%c0_9, %c0_10], %10 {strides = array<i32>} : memref<256x128xf32, #tpu.memory_space<vmem>>, vector<256x128xf32>,
    %c0_i32_11 = arith.constant 0 : i32
    %12 = arith.cmpi eq, %arg1, %c0_i32_11 : i32
    %13 = arith.extui %12 : i1 to i32
    %c0_i32_12 = arith.constant 0 : i32
    %14 = arith.cmpi ne, %13, %c0_i32_12 : i32
    scf.if %14 {
      %c0_13 = arith.constant 0 : index
      %c0_14 = arith.constant 0 : index
      %15 = vector.load %arg6[%c0_13, %c0_14] : memref<256x128xf32, #tpu.memory_space<vmem>>, vector<256x128xf32>
      %cst_15 = arith.constant 0.000000e+00 : f32
      %16 = vector.broadcast %cst_15 : f32 to vector<256x128xf32>
      %17 = arith.maximumf %15, %16 : vector<256x128xf32>
      %18 = arith.truncf %17 : vector<256x128xf32> to vector<256x128xbf16>
      %c0_16 = arith.constant 0 : index
      %c0_17 = arith.constant 0 : index
      %19 = vector.load %arg5[%c0_16, %c0_17] : memref<256x128xbf16, #tpu.memory_space<vmem>>, vector<256x128xbf16>
      tpu.vector_store %arg5[%c0_16, %c0_17], %18 {strides = array<i32>} : memref<256x128xbf16, #tpu.memory_space<vmem>>, vector<256x128xbf16>,
    } else {
    }
    return
  }
  func.func @transform_0(%arg0: i32, %arg1: i32) -> (i32, i32) {
    %c0_i32 = arith.constant 0 : i32
    return %arg0, %arg1 : i32, i32
  }
  func.func @transform_1(%arg0: i32, %arg1: i32) -> (i32, i32) {
    %c0_i32 = arith.constant 0 : i32
    %c0_i32_0 = arith.constant 0 : i32
    return %arg1, %c0_i32 : i32, i32
  }
  func.func @transform_2(%arg0: i32, %arg1: i32) -> (i32, i32) {
    %c0_i32 = arith.constant 0 : i32
    %c0_i32_0 = arith.constant 0 : i32
    %c0_i32_1 = arith.constant 0 : i32
    return %c0_i32, %c0_i32_0 : i32, i32
  }
  func.func @transform_3(%arg0: i32, %arg1: i32) -> (i32, i32) {
    %c0_i32 = arith.constant 0 : i32
    %c0_i32_0 = arith.constant 0 : i32
    return %arg0, %c0_i32 : i32, i32
  }
}

</mosaic_0001>

<bundles_post_ra>
// kernel: tpu_custom_call.1
= control target key start
LH: loop header
LB: loop body
LE: loop exit
PB: predicated region body
PF: predicated region fallthrough
CT: control target
= control target key end

     0   :  { %8 = vsyncpa [#allocation4], 0  ;;  %s2803_s0 = inlined_call_operand.hbm [shape: bf16[256,512], index: 0, kind: input, shape index: {}]   ;;  %s2804_s1 = inlined_call_operand.hbm [shape: bf16[512,128], index: 1, kind: input, shape index: {}]   ;;  %s2805_s2 = inlined_call_operand.hbm [shape: bf16[128,128], index: 2, kind: input, shape index: {}]   ;;  %s2806_s3 = inlined_call_operand.hbm [shape: bf16[256,128], index: 3, kind: output, shape index: {}]  }
   0x1   :  { %9 = vsyncpa [#allocation7], 0 }
   0x2   :  { %10 = vsyncpa [#allocation5], 0  ;;  %s2634_s12 = smov [#allocation6]  }
   0x3   :  { %s28_s13 = sshll.u32 %s2634_s12, 4  ;;  %s29_s13 = int_to_ptr.vmem [resolvable:$true] %s28_s13 }
   0x4   :  { %s2556_s14 = scalar_lea.vmem %s29_s13, 4096  ;;  %p2561_p1 = scmp.lt.s32.totalorder %s29_s13, %s29_s13 }
   0x5   :  { %p2557_p0 = scmp.ne.s32.totalorder %s29_s13, %s2556_s14  ;;  %p2562_p2 = scmp.lt.s32.totalorder %s2556_s14, %s2556_s14 }
   0x7   :  { %p2563_p3 = por %p2562_p2, %p2561_p1 }
   0x9   :  { %p2564_p4 = pnand %p2563_p3, %p2557_p0 }
   0xb   :  { %2567 = shalt.err (!%p2564_p4)
}
   0xc   :  { %s2635_s15 = smov 64   ;;  %s2636_s16 = smov 4  }
   0xd   :  { %34 = dma.hbm_to_vmem [thread:$0]  %s2804_s1, 4096, %s29_s13, [#allocation7], %s2635_s15, %s2635_s15, %s2636_s16  }
   0xe   :  { %s2637_s19 = smov [#allocation3]  }
   0xf   :  { %s16_s20 = sshll.u32 %s2637_s19, 4  ;;  %s17_s20 = int_to_ptr.vmem [resolvable:$true] %s16_s20 }
  0x10   :  { %s2576_s21 = scalar_lea.vmem %s17_s20, 8192  ;;  %p2581_p6 = scmp.lt.s32.totalorder %s17_s20, %s17_s20 }
  0x11   :  { %p2577_p5 = scmp.ne.s32.totalorder %s17_s20, %s2576_s21  ;;  %p2582_p7 = scmp.lt.s32.totalorder %s2576_s21, %s2576_s21 }
  0x13   :  { %p2583_p8 = por %p2582_p7, %p2581_p6 }
  0x15   :  { %p2584_p9 = pnand %p2583_p8, %p2577_p5 }
  0x17   :  { %2587 = shalt.err (!%p2584_p9)
}
  0x18   :  { %s2638_s22 = smov 256   ;;  %s2639_s23 = smov 16  }
  0x19   :  { %22 = dma.hbm_to_vmem [thread:$0]  %s2803_s0, 8192, %s17_s20, [#allocation4], %s2638_s22, %s2638_s22, %s2639_s23  }
  0x1a   :  { %s2640_s26 = smov [#allocation8]  }
  0x1b   :  { %s40_s27 = sshll.u32 %s2640_s26, 4  ;;  %s41_s27 = int_to_ptr.vmem [resolvable:$true] %s40_s27 }
  0x1c   :  { %s2596_s1 = scalar_lea.vmem %s41_s27, 1024  ;;  %p2601_p11 = scmp.lt.s32.totalorder %s41_s27, %s41_s27 }
  0x1d   :  { %p2597_p10 = scmp.ne.s32.totalorder %s41_s27, %s2596_s1  ;;  %p2602_p12 = scmp.lt.s32.totalorder %s2596_s1, %s2596_s1 }
  0x1f   :  { %p2603_p13 = por %p2602_p12, %p2601_p11 }
  0x21   :  { %p2604_p0 = pnand %p2603_p13, %p2597_p10 }
  0x23   :  { %2607 = shalt.err (!%p2604_p0)
}
  0x24   :  { %46 = dma.hbm_to_vmem [thread:$0]  %s2805_s2, 1024, %s41_s27, [#allocation7], %s2635_s15, %s2635_s15, %s2636_s16  }
  0x25   :  { %2628 = dma.done.wait [#allocation4], 8192  }
  0x26   :  { %2629 = vsyncadd [#allocation4], 4294959104 }
  0x27   :  { %2630 = dma.done.wait [#allocation7], 5120  }
  0x28   :  { %2631 = vsyncadd [#allocation7], 4294962176  ;;  %v2412_v0 = vld [vmem:[#allocation8 + $0x38] sm:$0xff]   ;;  %v2413_v1 = vld [vmem:[#allocation8 + $0x30] sm:$0xff]   ;;  %s2641_s0 = smov [#allocation9]  }
  0x29   :  { %2308 = vmatprep.subr.bf16.mxu0 %v2412_v0  ;;  %2388 = vmatprep.subr.bf16.mxu1 %v2412_v0  ;;  %v2414_v2 = vld [vmem:[#allocation8 + $0x28] sm:$0xff]   ;;  %v2415_v3 = vld [vmem:[#allocation8 + $0x20] sm:$0xff]   ;;  %v2416_v6 = vld [vmem:[#allocation8 + $0x18] sm:$0xff]   ;;  %s1768_s2 = sshll.u32 %s2641_s0, 4  ;;  %s1769_s2 = int_to_ptr.vmem [resolvable:$true] %s1768_s2 }
  0x2a   :  { %2309 = vmatpush3.bf16.msra.mxu0 %v2412_v0  ;;  %2396 = vmatpush3.bf16.msra.mxu1 %v2412_v0  ;;  %v2420_v4 = vld [vmem:[#allocation6] sm:$0xff]   ;;  %v2417_v7 = vld [vmem:[#allocation8 + $0x10] sm:$0xff]   ;;  %v2418_v8 = vld [vmem:[#allocation8 + $0x8] sm:$0xff]   ;;  %s2608_s30 = scalar_lea.vmem %s1769_s2, 2048  ;;  %p2613_p2 = scmp.lt.s32.totalorder %s1769_s2, %s1769_s2 }
  0x2b   :  { %2310 = vmatprep.subr.bf16.mxu0 %v2413_v1  ;;  %2389 = vmatprep.subr.bf16.mxu1 %v2413_v1  ;;  %v2421_v5 = vld [vmem:[#allocation6 + $0x80] sm:$0xff]   ;;  %v2422_v10 = vld [vmem:[#allocation6 + $0x8] sm:$0xff]   ;;  %v2424_v12 = vld [vmem:[#allocation6 + $0x10] sm:$0xff]   ;;  %p2609_p1 = scmp.ne.s32.totalorder %s1769_s2, %s2608_s30  ;;  %p2614_p3 = scmp.lt.s32.totalorder %s2608_s30, %s2608_s30 }
  0x2c   :  { %2324 = vmatprep.mubr.bf16.mxu0 %v2420_v4  ;;  %2356 = vmatprep.mubr.bf16.mxu1 %v2421_v5  ;;  %v2419_v9 = vld [vmem:[#allocation8] sm:$0xff]   ;;  %v2423_v11 = vld [vmem:[#allocation6 + $0x88] sm:$0xff]   ;;  %v2425_v13 = vld [vmem:[#allocation6 + $0x90] sm:$0xff]  }
  0x2d   :  { %v2426_v14 = vld [vmem:[#allocation6 + $0x18] sm:$0xff]   ;;  %v2428_v16 = vld [vmem:[#allocation6 + $0x20] sm:$0xff]   ;;  %v2430_v18 = vld [vmem:[#allocation6 + $0x28] sm:$0xff]   ;;  %p2615_p4 = por %p2614_p3, %p2613_p2 }
  0x2e   :  { %2311 = vmatpush3.bf16.msra.mxu0 %v2413_v1  ;;  %2397 = vmatpush3.bf16.msra.mxu1 %v2413_v1  ;;  %v2427_v15 = vld [vmem:[#allocation6 + $0x98] sm:$0xff]   ;;  %v2429_v17 = vld [vmem:[#allocation6 + $0xa0] sm:$0xff]   ;;  %v2431_v19 = vld [vmem:[#allocation6 + $0xa8] sm:$0xff]  }
  0x2f   :  { %2312 = vmatprep.subr.bf16.mxu0 %v2414_v2  ;;  %2390 = vmatprep.subr.bf16.mxu1 %v2414_v2  ;;  %v2432_v20 = vld [vmem:[#allocation6 + $0x30] sm:$0xff]   ;;  %v2434_v22 = vld [vmem:[#allocation6 + $0x38] sm:$0xff]   ;;  %v2436_v24 = vld [vmem:[#allocation6 + $0x40] sm:$0xff]   ;;  %p2616_p5 = pnand %p2615_p4, %p2609_p1 }
  0x30   :  { %v2433_v21 = vld [vmem:[#allocation6 + $0xb0] sm:$0xff]   ;;  %v2435_v23 = vld [vmem:[#allocation6 + $0xb8] sm:$0xff]   ;;  %v2437_v25 = vld [vmem:[#allocation6 + $0xc0] sm:$0xff]  }
  0x31   :  { %v2438_v26 = vld [vmem:[#allocation6 + $0x48] sm:$0xff]   ;;  %v2440_v28 = vld [vmem:[#allocation6 + $0x50] sm:$0xff]   ;;  %v2442_v30 = vld [vmem:[#allocation6 + $0x58] sm:$0xff]  }
  0x32   :  { %2313 = vmatpush3.bf16.msra.mxu0 %v2414_v2  ;;  %2398 = vmatpush3.bf16.msra.mxu1 %v2414_v2  ;;  %v2439_v27 = vld [vmem:[#allocation6 + $0xc8] sm:$0xff]   ;;  %v2441_v29 = vld [vmem:[#allocation6 + $0xd0] sm:$0xff]   ;;  %v2443_v31 = vld [vmem:[#allocation6 + $0xd8] sm:$0xff]  }
  0x33   :  { %2314 = vmatprep.subr.bf16.mxu0 %v2415_v3  ;;  %2391 = vmatprep.subr.bf16.mxu1 %v2415_v3  ;;  %v2444_v32 = vld [vmem:[#allocation6 + $0x60] sm:$0xff]   ;;  %v2446_v34 = vld [vmem:[#allocation6 + $0x68] sm:$0xff]   ;;  %v2448_v36 = vld [vmem:[#allocation6 + $0x70] sm:$0xff]  }
  0x34   :  { %v2445_v33 = vld [vmem:[#allocation6 + $0xe0] sm:$0xff]   ;;  %v2447_v35 = vld [vmem:[#allocation6 + $0xe8] sm:$0xff]   ;;  %v2449_v37 = vld [vmem:[#allocation6 + $0xf0] sm:$0xff]  }
  0x35   :  { %v2450_v38 = vld [vmem:[#allocation6 + $0x78] sm:$0xff]   ;;  %v2454_v40 = vld [vmem:[#allocation3 + $0x4] ss:$16 sps:$4 sm:$0xff]  }
  0x36   :  { %2315 = vmatpush3.bf16.msra.mxu0 %v2415_v3  ;;  %2399 = vmatpush3.bf16.msra.mxu1 %v2415_v3  ;;  %v2451_v39 = vld [vmem:[#allocation6 + $0xf8] sm:$0xff]  }
  0x37   :  { %2316 = vmatprep.subr.bf16.mxu0 %v2416_v6  ;;  %2392 = vmatprep.subr.bf16.mxu1 %v2416_v6  ;;  %v2457_v41 = vld [vmem:[#allocation3 + $0xc] ss:$16 sps:$4 sm:$0xff]  }
  0x3a   :  { %2317 = vmatpush3.bf16.msra.mxu0 %v2416_v6  ;;  %2400 = vmatpush3.bf16.msra.mxu1 %v2416_v6 }
  0x3b   :  { %2318 = vmatprep.subr.bf16.mxu0 %v2417_v7  ;;  %2393 = vmatprep.subr.bf16.mxu1 %v2417_v7 }
  0x3e   :  { %2319 = vmatpush3.bf16.msra.mxu0 %v2417_v7  ;;  %2401 = vmatpush3.bf16.msra.mxu1 %v2417_v7 }
  0x3f   :  { %2320 = vmatprep.subr.bf16.mxu0 %v2418_v8  ;;  %2394 = vmatprep.subr.bf16.mxu1 %v2418_v8 }
  0x42   :  { %2321 = vmatpush3.bf16.msra.mxu0 %v2418_v8  ;;  %2402 = vmatpush3.bf16.msra.mxu1 %v2418_v8 }
  0x43   :  { %2322 = vmatprep.subr.bf16.mxu0 %v2419_v9  ;;  %2395 = vmatprep.subr.bf16.mxu1 %v2419_v9 }
  0x46   :  { %2323 = vmatpush3.bf16.msra.mxu0 %v2419_v9  ;;  %2403 = vmatpush3.bf16.msra.mxu1 %v2419_v9 }
  0x49   :  { %2325 = vmatmul.mubr.bf16.vlgmr.msra.gmra.mxu0 %v2422_v10  ;;  %2357 = vmatmul.mubr.bf16.vlgmr.msra.gmra.mxu1 %v2423_v11 }
  0x4a   :  { %2328 = vmatprep.mubr.bf16.mxu0 %v2424_v12  ;;  %2360 = vmatprep.mubr.bf16.mxu1 %v2425_v13 }
  0x51   :  { %2329 = vmatmul.mubr.bf16.gmra.mxu0 %v2426_v14  ;;  %2361 = vmatmul.mubr.bf16.gmra.mxu1 %v2427_v15 }
  0x52   :  { %2332 = vmatprep.mubr.bf16.mxu0 %v2428_v16  ;;  %2364 = vmatprep.mubr.bf16.mxu1 %v2429_v17 }
  0x59   :  { %2333 = vmatmul.mubr.bf16.gmra.mxu0 %v2430_v18  ;;  %2365 = vmatmul.mubr.bf16.gmra.mxu1 %v2431_v19 }
  0x5a   :  { %2336 = vmatprep.mubr.bf16.mxu0 %v2432_v20  ;;  %2368 = vmatprep.mubr.bf16.mxu1 %v2433_v21 }
  0x61   :  { %2337 = vmatmul.mubr.bf16.gmra.mxu0 %v2434_v22  ;;  %2369 = vmatmul.mubr.bf16.gmra.mxu1 %v2435_v23 }
  0x62   :  { %2340 = vmatprep.mubr.bf16.mxu0 %v2436_v24  ;;  %2372 = vmatprep.mubr.bf16.mxu1 %v2437_v25 }
  0x69   :  { %2341 = vmatmul.mubr.bf16.gmra.mxu0 %v2438_v26  ;;  %2373 = vmatmul.mubr.bf16.gmra.mxu1 %v2439_v27 }
  0x6a   :  { %2344 = vmatprep.mubr.bf16.mxu0 %v2440_v28  ;;  %2376 = vmatprep.mubr.bf16.mxu1 %v2441_v29 }
  0x71   :  { %2345 = vmatmul.mubr.bf16.gmra.mxu0 %v2442_v30  ;;  %2377 = vmatmul.mubr.bf16.gmra.mxu1 %v2443_v31 }
  0x72   :  { %2348 = vmatprep.mubr.bf16.mxu0 %v2444_v32  ;;  %2380 = vmatprep.mubr.bf16.mxu1 %v2445_v33 }
  0x79   :  { %2349 = vmatmul.mubr.bf16.gmra.mxu0 %v2446_v34  ;;  %2381 = vmatmul.mubr.bf16.gmra.mxu1 %v2447_v35 }
  0x7a   :  { %2352 = vmatprep.mubr.bf16.mxu0 %v2448_v36  ;;  %2384 = vmatprep.mubr.bf16.mxu1 %v2449_v37 }
  0x81   :  { %2353 = vmatmul.mubr.bf16.gmra.mxu0 %v2450_v38  ;;  %2385 = vmatmul.mubr.bf16.gmra.mxu1 %v2451_v39 }
  0x82   :  { %1182 = vmatprep.mubr.bf16.mxu1 %v2454_v40  ;;  %1343 = vmatprep.mubr.bf16.mxu0 %v2457_v41 }
 0x109   :  { %v2677_v42 = vpop.f32.mrf.mxu0  ;;  %v2679_v43 = vpop.f32.mrf.mxu1 }
 0x10a   :  { %2815 = vst [vmem:[#allocation13_spill] sm:$0xff] %v2677_v42  ;;  %2816 = vst [vmem:[#allocation14_spill] sm:$0xff] %v2679_v43 }
 0x10b   :  { %v2681_v44 = vpop.f32.mrf.mxu0  ;;  %v2683_v45 = vpop.f32.mrf.mxu1 }
 0x10c   :  { %2817 = vst [vmem:[#allocation15_spill] sm:$0xff] %v2681_v44  ;;  %2818 = vst [vmem:[#allocation16_spill] sm:$0xff] %v2683_v45 }
 0x10d   :  { %v2685_v46 = vpop.f32.mrf.mxu0  ;;  %v2687_v47 = vpop.f32.mrf.mxu1 }
 0x10e   :  { %2819 = vst [vmem:[#allocation17_spill] sm:$0xff] %v2685_v46  ;;  %2820 = vst [vmem:[#allocation18_spill] sm:$0xff] %v2687_v47 }
 0x10f   :  { %v2693_v50 = vpop.f32.mrf.mxu0  ;;  %v2695_v51 = vpop.f32.mrf.mxu1 }
 0x110   :  { %2821 = vst [vmem:[#allocation19_spill] sm:$0xff] %v2693_v50  ;;  %2822 = vst [vmem:[#allocation20_spill] sm:$0xff] %v2695_v51 }
 0x111   :  { %v2701_v54 = vpop.f32.mrf.mxu0  ;;  %v2703_v55 = vpop.f32.mrf.mxu1 }
 0x113   :  { %v2705_v56 = vpop.f32.mrf.mxu0  ;;  %v2707_v57 = vpop.f32.mrf.mxu1 }
 0x115   :  { %v2709_v58 = vpop.f32.mrf.mxu0  ;;  %v2711_v59 = vpop.f32.mrf.mxu1 }
 0x117   :  { %v2717_v62 = vpop.f32.mrf.mxu0  ;;  %v2719_v63 = vpop.f32.mrf.mxu1 }
 0x119   :  { %v2725_v2 = vpop.f32.mrf.mxu0  ;;  %v2727_v3 = vpop.f32.mrf.mxu1 }
 0x11b   :  { %v2729_v4 = vpop.f32.mrf.mxu0  ;;  %v2731_v5 = vpop.f32.mrf.mxu1 }
 0x11d   :  { %v2733_v6 = vpop.f32.mrf.mxu0  ;;  %v2735_v7 = vpop.f32.mrf.mxu1 }
 0x11f   :  { %v2737_v8 = vpop.f32.mrf.mxu0  ;;  %v2739_v9 = vpop.f32.mrf.mxu1 }
 0x121   :  { %v2338_v10 = vpop.f32.mrf.mxu0  ;;  %v2370_v11 = vpop.f32.mrf.mxu1 }
 0x123   :  { %v495_v12 = vpop.f32.mrf.mxu0  ;;  %v623_v13 = vpop.f32.mrf.mxu1 }
 0x125   :  { %v2339_v14 = vpop.f32.mrf.mxu0  ;;  %v2371_v15 = vpop.f32.mrf.mxu1 }
 0x126   :  { %v805_v45 = vpack.c.bf16 %v2339_v14, %v2338_v10  ;;  %v821_v51 = vpack.c.bf16 %v2371_v15, %v2370_v11  ;;  %v2841_v10 = vld [vmem:[#allocation16_spill] sm:$0xff]  ;;  %v2462_v14 = vld [vmem:[#allocation3 + $0x20] ss:$16 sps:$4 sm:$0xff]  }
 0x127   :  { %v498_v16 = vpop.f32.mrf.mxu0  ;;  %v626_v17 = vpop.f32.mrf.mxu1  ;;  %v2463_v15 = vld [vmem:[#allocation3 + $0x28] ss:$16 sps:$4 sm:$0xff]  }
 0x128   :  { %v804_v42 = vpack.c.bf16 %v498_v16, %v495_v12  ;;  %v820_v46 = vpack.c.bf16 %v626_v17, %v623_v13  ;;  %v2458_v12 = vld [vmem:[#allocation3 + $0x24] ss:$16 sps:$4 sm:$0xff]   ;;  %v2460_v13 = vld [vmem:[#allocation3 + $0x2c] ss:$16 sps:$4 sm:$0xff]  }
 0x129   :  { %v2741_v18 = vpop.f32.mrf.mxu0  ;;  %v2743_v19 = vpop.f32.mrf.mxu1  ;;  %v2464_v16 = vld [vmem:[#allocation3 + $0x44] ss:$16 sps:$4 sm:$0xff]   ;;  %v2466_v17 = vld [vmem:[#allocation3 + $0x4c] ss:$16 sps:$4 sm:$0xff]  }
 0x12b   :  { %v2745_v20 = vpop.f32.mrf.mxu0  ;;  %v2747_v21 = vpop.f32.mrf.mxu1 }
 0x12c   :  { %2823 = vst [vmem:[#allocation21_spill] sm:$0xff] %v2747_v21 }
 0x12d   :  { %v2749_v22 = vpop.f32.mrf.mxu0  ;;  %v2751_v23 = vpop.f32.mrf.mxu1 }
 0x12f   :  { %v2753_v24 = vpop.f32.mrf.mxu0  ;;  %v2755_v25 = vpop.f32.mrf.mxu1 }
 0x130   :  { %2824 = vst [vmem:[#allocation22_spill] sm:$0xff] %v2755_v25 }
 0x131   :  { %v2346_v26 = vpop.f32.mrf.mxu0  ;;  %v2378_v27 = vpop.f32.mrf.mxu1 }
 0x133   :  { %v527_v28 = vpop.f32.mrf.mxu0  ;;  %v655_v29 = vpop.f32.mrf.mxu1 }
 0x135   :  { %v2347_v30 = vpop.f32.mrf.mxu0  ;;  %v2379_v31 = vpop.f32.mrf.mxu1 }
 0x137   :  { %v530_v32 = vpop.f32.mrf.mxu0  ;;  %v658_v33 = vpop.f32.mrf.mxu1 }
 0x139   :  { %v2350_v34 = vpop.f32.mrf.mxu0  ;;  %v2382_v35 = vpop.f32.mrf.mxu1 }
 0x13b   :  { %v543_v36 = vpop.f32.mrf.mxu0  ;;  %v671_v37 = vpop.f32.mrf.mxu1 }
 0x13d   :  { %v2351_v38 = vpop.f32.mrf.mxu0  ;;  %v2383_v39 = vpop.f32.mrf.mxu1 }
 0x13e   :  { %v811_v25 = vpack.c.bf16 %v2351_v38, %v2350_v34  ;;  %v827_v21 = vpack.c.bf16 %v2383_v39, %v2382_v35  ;;  %v2492_v34 = vld [vmem:[#allocation3 + $0xc0] ss:$16 sps:$4 sm:$0xff]   ;;  %v2493_v35 = vld [vmem:[#allocation3 + $0xc8] ss:$16 sps:$4 sm:$0xff]  }
 0x13f   :  { %v546_v40 = vpop.f32.mrf.mxu0  ;;  %v674_v41 = vpop.f32.mrf.mxu1  ;;  %v2498_v38 = vld [vmem:[#allocation3 + $0xe0] ss:$16 sps:$4 sm:$0xff]   ;;  %v2499_v39 = vld [vmem:[#allocation3 + $0xe8] ss:$16 sps:$4 sm:$0xff]  }
 0x141   :  { %v2354_v53 = vpop.f32.mrf.mxu0  ;;  %v2386_v52 = vpop.f32.mrf.mxu1 }
 0x143   :  { %v559_v49 = vpop.f32.mrf.mxu0  ;;  %v687_v48 = vpop.f32.mrf.mxu1 }
 0x145   :  { %v2355_v1 = vpop.f32.mrf.mxu0  ;;  %v2387_v0 = vpop.f32.mrf.mxu1 }
 0x146   :  { %v813_v61 = vpack.c.bf16 %v2355_v1, %v2354_v53  ;;  %v829_v60 = vpack.c.bf16 %v2387_v0, %v2386_v52  ;;  %v803_v52 = vpack.c.bf16 %v2733_v6, %v2725_v2  ;;  %v2826_v53 = vpack.c.bf16 %v2711_v59, %v2703_v55  ;;  %v2830_v59 = vld [vmem:[#allocation22_spill] sm:$0xff]  ;;  %v2831_v2 = vld [vmem:[#allocation17_spill] sm:$0xff] }
 0x147   :  { %v562_v44 = vpop.f32.mrf.mxu0  ;;  %v690_v50 = vpop.f32.mrf.mxu1  ;;  %v2827_v0 = vpack.c.bf16 %v2717_v62, %v2705_v56  ;;  %v806_v55 = vpack.c.bf16 %v2753_v24, %v2745_v20  ;;  %v2835_v6 = vld [vmem:[#allocation14_spill] sm:$0xff]  ;;  %v2470_v20 = vld [vmem:[#allocation3 + $0x64] ss:$16 sps:$4 sm:$0xff]  }
 0x148   :  { %v812_v43 = vpack.c.bf16 %v562_v44, %v559_v49  ;;  %v828_v47 = vpack.c.bf16 %v690_v50, %v687_v48  ;;  %2084 = vmatprep.subr.bf16.mxu1 %v813_v61  ;;  %2196 = vmatprep.subr.bf16.mxu0 %v829_v60  ;;  %v819_v44 = vpack.c.bf16 %v2735_v7, %v2727_v3  ;;  %v2832_v3 = vld [vmem:[#allocation13_spill] sm:$0xff]  ;;  %v2455_v62 = vld [vmem:[#allocation3 + $0x8] ss:$16 sps:$4 sm:$0xff]   ;;  %v2838_v7 = vld [vmem:[#allocation15_spill] sm:$0xff] }
 0x149   :  { %2085 = vmatpush3.bf16.msra.mxu1 %v805_v45  ;;  %2197 = vmatpush3.bf16.msra.mxu0 %v821_v51  ;;  %v810_v48 = vpack.c.bf16 %v546_v40, %v543_v36  ;;  %v826_v49 = vpack.c.bf16 %v674_v41, %v671_v37  ;;  %v809_v45 = vpack.c.bf16 %v2347_v30, %v2346_v26  ;;  %v2476_v24 = vld [vmem:[#allocation3 + $0x84] ss:$16 sps:$4 sm:$0xff]   ;;  %v2480_v26 = vld [vmem:[#allocation3 + $0x80] ss:$16 sps:$4 sm:$0xff]   ;;  %v2496_v37 = vld [vmem:[#allocation3 + $0xec] ss:$16 sps:$4 sm:$0xff]  }
 0x14a   :  { %2086 = vmatprep.subr.bf16.mxu1 %v812_v43  ;;  %2198 = vmatprep.subr.bf16.mxu0 %v828_v47  ;;  %v802_v43 = vpack.c.bf16 %v2737_v8, %v2729_v4  ;;  %v808_v47 = vpack.c.bf16 %v530_v32, %v527_v28  ;;  %v824_v50 = vpack.c.bf16 %v658_v33, %v655_v29  ;;  %v2482_v28 = vld [vmem:[#allocation3 + $0xa4] ss:$16 sps:$4 sm:$0xff]   ;;  %v2484_v29 = vld [vmem:[#allocation3 + $0xac] ss:$16 sps:$4 sm:$0xff]   ;;  %v2486_v30 = vld [vmem:[#allocation3 + $0xa0] ss:$16 sps:$4 sm:$0xff]  }
 0x14b   :  { %v2825_v51 = vpack.c.bf16 %v2709_v58, %v2701_v54  ;;  %v807_v60 = vpack.c.bf16 %v2749_v22, %v2741_v18  ;;  %v823_v61 = vpack.c.bf16 %v2751_v23, %v2743_v19  ;;  %v2828_v54 = vpack.c.bf16 %v2719_v63, %v2707_v57  ;;  %v2829_v58 = vld [vmem:[#allocation21_spill] sm:$0xff]  ;;  %v2837_v63 = vld [vmem:[#allocation19_spill] sm:$0xff]  ;;  %v2469_v19 = vld [vmem:[#allocation3 + $0x48] ss:$16 sps:$4 sm:$0xff]  }
 0x14c   :  { %v822_v1 = vpack.c.bf16 %v2830_v59, %v2829_v58  ;;  %v2833_v4 = vpack.c.bf16 %v2831_v2, %v2832_v3  ;;  %v2452_v57 = vld [vmem:[#allocation3] ss:$16 sps:$4 sm:$0xff]   ;;  %v2839_v8 = vpack.c.bf16 %v2837_v63, %v2838_v7  ;;  %v2475_v23 = vld [vmem:[#allocation3 + $0x68] ss:$16 sps:$4 sm:$0xff]   ;;  %v2488_v32 = vld [vmem:[#allocation3 + $0xc4] ss:$16 sps:$4 sm:$0xff]  }
 0x14d   :  { %2087 = vmatpush3.bf16.msra.mxu1 %v804_v42  ;;  %2199 = vmatpush3.bf16.msra.mxu0 %v820_v46  ;;  %v818_v42 = vpack.c.bf16 %v2739_v9, %v2731_v5  ;;  %v825_v46 = vpack.c.bf16 %v2379_v31, %v2378_v27  ;;  %v2834_v5 = vld [vmem:[#allocation18_spill] sm:$0xff]  ;;  %v2840_v9 = vld [vmem:[#allocation20_spill] sm:$0xff]  ;;  %v2468_v18 = vld [vmem:[#allocation3 + $0x40] ss:$16 sps:$4 sm:$0xff]  }
 0x14e   :  { %2088 = vmatprep.subr.bf16.mxu1 %v811_v25  ;;  %2200 = vmatprep.subr.bf16.mxu0 %v827_v21  ;;  %v2836_v56 = vpack.c.bf16 %v2834_v5, %v2835_v6  ;;  %v2842_v11 = vpack.c.bf16 %v2840_v9, %v2841_v10  ;;  %v2472_v21 = vld [vmem:[#allocation3 + $0x6c] ss:$16 sps:$4 sm:$0xff]   ;;  %v2474_v22 = vld [vmem:[#allocation3 + $0x60] ss:$16 sps:$4 sm:$0xff]   ;;  %v2481_v27 = vld [vmem:[#allocation3 + $0x88] ss:$16 sps:$4 sm:$0xff]  }
 0x14f   :  { %v2478_v25 = vld [vmem:[#allocation3 + $0x8c] ss:$16 sps:$4 sm:$0xff]   ;;  %v2487_v31 = vld [vmem:[#allocation3 + $0xa8] ss:$16 sps:$4 sm:$0xff]   ;;  %v2494_v36 = vld [vmem:[#allocation3 + $0xe4] ss:$16 sps:$4 sm:$0xff]  }
 0x150   :  { %v2490_v33 = vld [vmem:[#allocation3 + $0xcc] ss:$16 sps:$4 sm:$0xff]   ;;  %v2500_v40 = vld [vmem:[#allocation3 + $0x104] ss:$16 sps:$4 sm:$0xff]   ;;  %v2529_v58 = vld [vmem:[#allocation3 + $0x188] ss:$16 sps:$4 sm:$0xff]  }
 0x151   :  { %2089 = vmatpush3.bf16.msra.mxu1 %v803_v52  ;;  %2201 = vmatpush3.bf16.msra.mxu0 %v819_v44  ;;  %v2502_v41 = vld [vmem:[#allocation3 + $0x10c] ss:$16 sps:$4 sm:$0xff]   ;;  %v2504_v52 = vld [vmem:[#allocation3 + $0x100] ss:$16 sps:$4 sm:$0xff]   ;;  %v2505_v44 = vld [vmem:[#allocation3 + $0x108] ss:$16 sps:$4 sm:$0xff]  }
 0x152   :  { %2090 = vmatprep.subr.bf16.mxu1 %v810_v48  ;;  %2202 = vmatprep.subr.bf16.mxu0 %v826_v49  ;;  %v2506_v48 = vld [vmem:[#allocation3 + $0x124] ss:$16 sps:$4 sm:$0xff]   ;;  %v2508_v49 = vld [vmem:[#allocation3 + $0x12c] ss:$16 sps:$4 sm:$0xff]   ;;  %v2534_v2 = vld [vmem:[#allocation3 + $0x1a0] ss:$16 sps:$4 sm:$0xff]  }
 0x153   :  { %v2530_v59 = vld [vmem:[#allocation3 + $0x1a4] ss:$16 sps:$4 sm:$0xff]   ;;  %v2535_v3 = vld [vmem:[#allocation3 + $0x1a8] ss:$16 sps:$4 sm:$0xff]   ;;  %v2538_v5 = vld [vmem:[#allocation3 + $0x1cc] ss:$16 sps:$4 sm:$0xff]  }
 0x154   :  { %v2540_v6 = vld [vmem:[#allocation3 + $0x1c0] ss:$16 sps:$4 sm:$0xff]   ;;  %v2547_v7 = vld [vmem:[#allocation3 + $0x1e8] ss:$16 sps:$4 sm:$0xff]  }
 0x155   :  { %2091 = vmatpush3.bf16.msra.mxu1 %v802_v43  ;;  %2203 = vmatpush3.bf16.msra.mxu0 %v818_v42  ;;  %v2510_v43 = vld [vmem:[#allocation3 + $0x120] ss:$16 sps:$4 sm:$0xff]   ;;  %v2511_v42 = vld [vmem:[#allocation3 + $0x128] ss:$16 sps:$4 sm:$0xff]  }
 0x156   :  { %2092 = vmatprep.subr.bf16.mxu1 %v809_v45  ;;  %2204 = vmatprep.subr.bf16.mxu0 %v825_v46  ;;  %v2512_v45 = vld [vmem:[#allocation3 + $0x144] ss:$16 sps:$4 sm:$0xff]   ;;  %v2514_v46 = vld [vmem:[#allocation3 + $0x14c] ss:$16 sps:$4 sm:$0xff]   ;;  %v2546_v63 = vld [vmem:[#allocation3 + $0x1e0] ss:$16 sps:$4 sm:$0xff]  }
 0x159   :  { %2093 = vmatpush3.bf16.msra.mxu1 %v2825_v51  ;;  %2205 = vmatpush3.bf16.msra.mxu0 %v2826_v53  ;;  %v2518_v51 = vld [vmem:[#allocation3 + $0x164] ss:$16 sps:$4 sm:$0xff]   ;;  %v2520_v53 = vld [vmem:[#allocation3 + $0x16c] ss:$16 sps:$4 sm:$0xff]  }
 0x15a   :  { %2094 = vmatprep.subr.bf16.mxu1 %v808_v47  ;;  %2206 = vmatprep.subr.bf16.mxu0 %v824_v50  ;;  %v2516_v47 = vld [vmem:[#allocation3 + $0x140] ss:$16 sps:$4 sm:$0xff]   ;;  %v2517_v50 = vld [vmem:[#allocation3 + $0x148] ss:$16 sps:$4 sm:$0xff]  }
 0x15d   :  { %2095 = vmatpush3.bf16.msra.mxu1 %v2827_v0  ;;  %2207 = vmatpush3.bf16.msra.mxu0 %v2828_v54  ;;  %v2524_v0 = vld [vmem:[#allocation3 + $0x184] ss:$16 sps:$4 sm:$0xff]   ;;  %v2526_v54 = vld [vmem:[#allocation3 + $0x18c] ss:$16 sps:$4 sm:$0xff]  }
 0x15e   :  { %2096 = vmatprep.subr.bf16.mxu1 %v807_v60  ;;  %2208 = vmatprep.subr.bf16.mxu0 %v823_v61  ;;  %v2522_v60 = vld [vmem:[#allocation3 + $0x160] ss:$16 sps:$4 sm:$0xff]   ;;  %v2523_v61 = vld [vmem:[#allocation3 + $0x168] ss:$16 sps:$4 sm:$0xff]  }
 0x161   :  { %2097 = vmatpush3.bf16.msra.mxu1 %v2833_v4  ;;  %2209 = vmatpush3.bf16.msra.mxu0 %v2836_v56  ;;  %v2536_v4 = vld [vmem:[#allocation3 + $0x1c4] ss:$16 sps:$4 sm:$0xff]   ;;  %v2541_v56 = vld [vmem:[#allocation3 + $0x1c8] ss:$16 sps:$4 sm:$0xff]  }
 0x162   :  { %2098 = vmatprep.subr.bf16.mxu1 %v806_v55  ;;  %2210 = vmatprep.subr.bf16.mxu0 %v822_v1  ;;  %v2528_v55 = vld [vmem:[#allocation3 + $0x180] ss:$16 sps:$4 sm:$0xff]   ;;  %v2532_v1 = vld [vmem:[#allocation3 + $0x1ac] ss:$16 sps:$4 sm:$0xff]  }
 0x165   :  { %2099 = vmatpush3.bf16.msra.mxu1 %v2839_v8  ;;  %2211 = vmatpush3.bf16.msra.mxu0 %v2842_v11 }
 0x168   :  { %1183 = vmatmul.mubr.bf16.vlgmr.msra.gmra.mxu1 %v2452_v57  ;;  %1344 = vmatmul.mubr.bf16.vlgmr.msra.gmra.mxu0 %v2455_v62  ;;  %v2542_v57 = vld [vmem:[#allocation3 + $0x1e4] ss:$16 sps:$4 sm:$0xff]   ;;  %v2544_v62 = vld [vmem:[#allocation3 + $0x1ec] ss:$16 sps:$4 sm:$0xff]  }
 0x169   :  { %1190 = vmatprep.mubr.bf16.mxu1 %v2458_v12  ;;  %1351 = vmatprep.mubr.bf16.mxu0 %v2460_v13 }
 0x170   :  { %1191 = vmatmul.mubr.bf16.gmra.mxu1 %v2462_v14  ;;  %1352 = vmatmul.mubr.bf16.gmra.mxu0 %v2463_v15 }
 0x171   :  { %1198 = vmatprep.mubr.bf16.mxu1 %v2464_v16  ;;  %1359 = vmatprep.mubr.bf16.mxu0 %v2466_v17 }
 0x178   :  { %1199 = vmatmul.mubr.bf16.gmra.mxu1 %v2468_v18  ;;  %1360 = vmatmul.mubr.bf16.gmra.mxu0 %v2469_v19 }
 0x179   :  { %1206 = vmatprep.mubr.bf16.mxu1 %v2470_v20  ;;  %1367 = vmatprep.mubr.bf16.mxu0 %v2472_v21 }
 0x180   :  { %1207 = vmatmul.mubr.bf16.gmra.mxu1 %v2474_v22  ;;  %1368 = vmatmul.mubr.bf16.gmra.mxu0 %v2475_v23 }
 0x181   :  { %1214 = vmatprep.mubr.bf16.mxu1 %v2476_v24  ;;  %1375 = vmatprep.mubr.bf16.mxu0 %v2478_v25 }
 0x188   :  { %1215 = vmatmul.mubr.bf16.gmra.mxu1 %v2480_v26  ;;  %1376 = vmatmul.mubr.bf16.gmra.mxu0 %v2481_v27 }
 0x189   :  { %1222 = vmatprep.mubr.bf16.mxu1 %v2482_v28  ;;  %1383 = vmatprep.mubr.bf16.mxu0 %v2484_v29 }
 0x190   :  { %1223 = vmatmul.mubr.bf16.gmra.mxu1 %v2486_v30  ;;  %1384 = vmatmul.mubr.bf16.gmra.mxu0 %v2487_v31 }
 0x191   :  { %1230 = vmatprep.mubr.bf16.mxu1 %v2488_v32  ;;  %1391 = vmatprep.mubr.bf16.mxu0 %v2490_v33 }
 0x198   :  { %1231 = vmatmul.mubr.bf16.gmra.mxu1 %v2492_v34  ;;  %1392 = vmatmul.mubr.bf16.gmra.mxu0 %v2493_v35 }
 0x199   :  { %1238 = vmatprep.mubr.bf16.mxu1 %v2494_v36  ;;  %1399 = vmatprep.mubr.bf16.mxu0 %v2496_v37 }
 0x1a0   :  { %1239 = vmatmul.mubr.bf16.gmra.mxu1 %v2498_v38  ;;  %1400 = vmatmul.mubr.bf16.gmra.mxu0 %v2499_v39 }
 0x1a1   :  { %1246 = vmatprep.mubr.bf16.mxu1 %v2500_v40  ;;  %1407 = vmatprep.mubr.bf16.mxu0 %v2502_v41 }
 0x1a8   :  { %1247 = vmatmul.mubr.bf16.gmra.mxu1 %v2504_v52  ;;  %1408 = vmatmul.mubr.bf16.gmra.mxu0 %v2505_v44 }
 0x1a9   :  { %1254 = vmatprep.mubr.bf16.mxu1 %v2506_v48  ;;  %1415 = vmatprep.mubr.bf16.mxu0 %v2508_v49 }
 0x1b0   :  { %1255 = vmatmul.mubr.bf16.gmra.mxu1 %v2510_v43  ;;  %1416 = vmatmul.mubr.bf16.gmra.mxu0 %v2511_v42 }
 0x1b1   :  { %1262 = vmatprep.mubr.bf16.mxu1 %v2512_v45  ;;  %1423 = vmatprep.mubr.bf16.mxu0 %v2514_v46 }
 0x1b8   :  { %1263 = vmatmul.mubr.bf16.gmra.mxu1 %v2516_v47  ;;  %1424 = vmatmul.mubr.bf16.gmra.mxu0 %v2517_v50 }
 0x1b9   :  { %1270 = vmatprep.mubr.bf16.mxu1 %v2518_v51  ;;  %1431 = vmatprep.mubr.bf16.mxu0 %v2520_v53 }
 0x1c0   :  { %1271 = vmatmul.mubr.bf16.gmra.mxu1 %v2522_v60  ;;  %1432 = vmatmul.mubr.bf16.gmra.mxu0 %v2523_v61 }
 0x1c1   :  { %1278 = vmatprep.mubr.bf16.mxu1 %v2524_v0  ;;  %1439 = vmatprep.mubr.bf16.mxu0 %v2526_v54 }
 0x1c8   :  { %1279 = vmatmul.mubr.bf16.gmra.mxu1 %v2528_v55  ;;  %1440 = vmatmul.mubr.bf16.gmra.mxu0 %v2529_v58 }
 0x1c9   :  { %1286 = vmatprep.mubr.bf16.mxu1 %v2530_v59  ;;  %1447 = vmatprep.mubr.bf16.mxu0 %v2532_v1 }
 0x1d0   :  { %1287 = vmatmul.mubr.bf16.gmra.mxu1 %v2534_v2  ;;  %1448 = vmatmul.mubr.bf16.gmra.mxu0 %v2535_v3 }
 0x1d1   :  { %1294 = vmatprep.mubr.bf16.mxu1 %v2536_v4  ;;  %1455 = vmatprep.mubr.bf16.mxu0 %v2538_v5 }
 0x1d8   :  { %1295 = vmatmul.mubr.bf16.gmra.mxu1 %v2540_v6  ;;  %1456 = vmatmul.mubr.bf16.gmra.mxu0 %v2541_v56 }
 0x1d9   :  { %1302 = vmatprep.mubr.bf16.mxu1 %v2542_v57  ;;  %1463 = vmatprep.mubr.bf16.mxu0 %v2544_v62 }
 0x1e0   :  { %1303 = vmatmul.mubr.bf16.gmra.mxu1 %v2546_v63  ;;  %1464 = vmatmul.mubr.bf16.gmra.mxu0 %v2547_v7 }
 0x228   :  { %v2100_v8 = vpop.f32.mrf.mxu1  ;;  %v2212_v9 = vpop.f32.mrf.mxu0 }
 0x22a   :  { %v2101_v10 = vpop.f32.mrf.mxu1  ;;  %v2213_v11 = vpop.f32.mrf.mxu0 }
 0x22b   :  { %v2102_v12 = vadd.f32 %v2101_v10, %v2100_v8  ;;  %v2214_v13 = vadd.f32 %v2213_v11, %v2212_v9 }
 0x22c   :  { %v2103_v14 = vpop.f32.mrf.mxu1  ;;  %v2215_v15 = vpop.f32.mrf.mxu0 }
 0x22d   :  { %v1346_v18 = vadd.f32 %v2214_v13, %v2102_v12 }
 0x22e   :  { %v2104_v16 = vpop.f32.mrf.mxu1  ;;  %v2216_v17 = vpop.f32.mrf.mxu0 }
 0x22f   :  { %v2105_v19 = vadd.f32 %v2104_v16, %v2103_v14  ;;  %v2217_v20 = vadd.f32 %v2216_v17, %v2215_v15  ;;  %v1571_v26 = vmax.f32 %v1346_v18, 0.0 }
 0x230   :  { %v2106_v21 = vpop.f32.mrf.mxu1  ;;  %v2218_v22 = vpop.f32.mrf.mxu0 }
 0x231   :  { %v1349_v23 = vadd.f32 %v2217_v20, %v2105_v19 }
 0x232   :  { %v2107_v24 = vpop.f32.mrf.mxu1  ;;  %v2219_v25 = vpop.f32.mrf.mxu0 }
 0x233   :  { %v1572_v27 = vmax.f32 %v1349_v23, 0.0  ;;  %v2108_v28 = vadd.f32 %v2107_v24, %v2106_v21  ;;  %v2220_v29 = vadd.f32 %v2219_v25, %v2218_v22 }
 0x234   :  { %v2109_v30 = vpop.f32.mrf.mxu1  ;;  %v2221_v31 = vpop.f32.mrf.mxu0 }
 0x235   :  { %v1952_v32 = vpack.c.bf16 %v1572_v27, %v1571_v26  ;;  %v1354_v35 = vadd.f32 %v2220_v29, %v2108_v28 }
 0x236   :  { %v2110_v33 = vpop.f32.mrf.mxu1  ;;  %v2222_v34 = vpop.f32.mrf.mxu0 }
 0x237   :  { %1953 = vst [vmem:[#allocation9] sm:$0xff] %v1952_v32   ;;  %v2111_v36 = vadd.f32 %v2110_v33, %v2109_v30  ;;  %v2223_v37 = vadd.f32 %v2222_v34, %v2221_v31  ;;  %v1573_v44 = vmax.f32 %v1354_v35, 0.0 }
 0x238   :  { %v2112_v38 = vpop.f32.mrf.mxu1  ;;  %v2224_v39 = vpop.f32.mrf.mxu0 }
 0x239   :  { %v1357_v40 = vadd.f32 %v2223_v37, %v2111_v36 }
 0x23a   :  { %v2113_v41 = vpop.f32.mrf.mxu1  ;;  %v2225_v52 = vpop.f32.mrf.mxu0 }
 0x23b   :  { %v1574_v48 = vmax.f32 %v1357_v40, 0.0  ;;  %v2114_v49 = vadd.f32 %v2113_v41, %v2112_v38  ;;  %v2226_v43 = vadd.f32 %v2225_v52, %v2224_v39 }
 0x23c   :  { %v2115_v42 = vpop.f32.mrf.mxu1  ;;  %v2227_v45 = vpop.f32.mrf.mxu0 }
 0x23d   :  { %v1957_v46 = vpack.c.bf16 %v1574_v48, %v1573_v44  ;;  %v1362_v51 = vadd.f32 %v2226_v43, %v2114_v49 }
 0x23e   :  { %v2116_v47 = vpop.f32.mrf.mxu1  ;;  %v2228_v50 = vpop.f32.mrf.mxu0 }
 0x23f   :  { %2029 = vst [vmem:[#allocation9 + $0x8] sm:$0xff] %v1957_v46   ;;  %v2117_v53 = vadd.f32 %v2116_v47, %v2115_v42  ;;  %v2229_v60 = vadd.f32 %v2228_v50, %v2227_v45  ;;  %v1575_v59 = vmax.f32 %v1362_v51, 0.0 }
 0x240   :  { %v2118_v61 = vpop.f32.mrf.mxu1  ;;  %v2230_v0 = vpop.f32.mrf.mxu0 }
 0x241   :  { %v1365_v54 = vadd.f32 %v2229_v60, %v2117_v53 }
 0x242   :  { %v2119_v55 = vpop.f32.mrf.mxu1  ;;  %v2231_v58 = vpop.f32.mrf.mxu0 }
 0x243   :  { %v1576_v1 = vmax.f32 %v1365_v54, 0.0  ;;  %v2120_v2 = vadd.f32 %v2119_v55, %v2118_v61  ;;  %v2232_v3 = vadd.f32 %v2231_v58, %v2230_v0 }
 0x244   :  { %v2121_v4 = vpop.f32.mrf.mxu1  ;;  %v2233_v5 = vpop.f32.mrf.mxu0 }
 0x245   :  { %v1962_v6 = vpack.c.bf16 %v1576_v1, %v1575_v59  ;;  %v1370_v62 = vadd.f32 %v2232_v3, %v2120_v2 }
 0x246   :  { %v2122_v56 = vpop.f32.mrf.mxu1  ;;  %v2234_v57 = vpop.f32.mrf.mxu0 }
 0x247   :  { %2030 = vst [vmem:[#allocation9 + $0x10] sm:$0xff] %v1962_v6   ;;  %v2123_v63 = vadd.f32 %v2122_v56, %v2121_v4  ;;  %v2235_v7 = vadd.f32 %v2234_v57, %v2233_v5  ;;  %v1577_v13 = vmax.f32 %v1370_v62, 0.0 }
 0x248   :  { %v2124_v8 = vpop.f32.mrf.mxu1  ;;  %v2236_v9 = vpop.f32.mrf.mxu0 }
 0x249   :  { %v1373_v10 = vadd.f32 %v2235_v7, %v2123_v63 }
 0x24a   :  { %v2125_v11 = vpop.f32.mrf.mxu1  ;;  %v2237_v12 = vpop.f32.mrf.mxu0 }
 0x24b   :  { %v1578_v14 = vmax.f32 %v1373_v10, 0.0  ;;  %v2126_v15 = vadd.f32 %v2125_v11, %v2124_v8  ;;  %v2238_v16 = vadd.f32 %v2237_v12, %v2236_v9 }
 0x24c   :  { %v2127_v17 = vpop.f32.mrf.mxu1  ;;  %v2239_v18 = vpop.f32.mrf.mxu0 }
 0x24d   :  { %v1967_v19 = vpack.c.bf16 %v1578_v14, %v1577_v13  ;;  %v1378_v22 = vadd.f32 %v2238_v16, %v2126_v15 }
 0x24e   :  { %v2128_v20 = vpop.f32.mrf.mxu1  ;;  %v2240_v21 = vpop.f32.mrf.mxu0 }
 0x24f   :  { %2031 = vst [vmem:[#allocation9 + $0x18] sm:$0xff] %v1967_v19   ;;  %v2129_v23 = vadd.f32 %v2128_v20, %v2127_v17  ;;  %v2241_v24 = vadd.f32 %v2240_v21, %v2239_v18  ;;  %v1579_v30 = vmax.f32 %v1378_v22, 0.0 }
 0x250   :  { %v2130_v25 = vpop.f32.mrf.mxu1  ;;  %v2242_v26 = vpop.f32.mrf.mxu0 }
 0x251   :  { %v1381_v27 = vadd.f32 %v2241_v24, %v2129_v23 }
 0x252   :  { %v2131_v28 = vpop.f32.mrf.mxu1  ;;  %v2243_v29 = vpop.f32.mrf.mxu0 }
 0x253   :  { %v1580_v31 = vmax.f32 %v1381_v27, 0.0  ;;  %v2132_v32 = vadd.f32 %v2131_v28, %v2130_v25  ;;  %v2244_v33 = vadd.f32 %v2243_v29, %v2242_v26 }
 0x254   :  { %v2133_v34 = vpop.f32.mrf.mxu1  ;;  %v2245_v35 = vpop.f32.mrf.mxu0 }
 0x255   :  { %v1972_v36 = vpack.c.bf16 %v1580_v31, %v1579_v30  ;;  %v1386_v39 = vadd.f32 %v2244_v33, %v2132_v32 }
 0x256   :  { %v2134_v37 = vpop.f32.mrf.mxu1  ;;  %v2246_v38 = vpop.f32.mrf.mxu0 }
 0x257   :  { %2032 = vst [vmem:[#allocation9 + $0x20] sm:$0xff] %v1972_v36   ;;  %v2135_v40 = vadd.f32 %v2134_v37, %v2133_v34  ;;  %v2247_v41 = vadd.f32 %v2246_v38, %v2245_v35  ;;  %v1581_v42 = vmax.f32 %v1386_v39, 0.0 }
 0x258   :  { %v2136_v52 = vpop.f32.mrf.mxu1  ;;  %v2248_v44 = vpop.f32.mrf.mxu0 }
 0x259   :  { %v1389_v48 = vadd.f32 %v2247_v41, %v2135_v40 }
 0x25a   :  { %v2137_v49 = vpop.f32.mrf.mxu1  ;;  %v2249_v43 = vpop.f32.mrf.mxu0 }
 0x25b   :  { %v1582_v45 = vmax.f32 %v1389_v48, 0.0  ;;  %v2138_v46 = vadd.f32 %v2137_v49, %v2136_v52  ;;  %v2250_v47 = vadd.f32 %v2249_v43, %v2248_v44 }
 0x25c   :  { %v2139_v50 = vpop.f32.mrf.mxu1  ;;  %v2251_v51 = vpop.f32.mrf.mxu0 }
 0x25d   :  { %v1977_v53 = vpack.c.bf16 %v1582_v45, %v1581_v42  ;;  %v1394_v0 = vadd.f32 %v2250_v47, %v2138_v46 }
 0x25e   :  { %v2140_v60 = vpop.f32.mrf.mxu1  ;;  %v2252_v61 = vpop.f32.mrf.mxu0 }
 0x25f   :  { %2033 = vst [vmem:[#allocation9 + $0x28] sm:$0xff] %v1977_v53   ;;  %v2141_v54 = vadd.f32 %v2140_v60, %v2139_v50  ;;  %v2253_v55 = vadd.f32 %v2252_v61, %v2251_v51  ;;  %v1583_v4 = vmax.f32 %v1394_v0, 0.0 }
 0x260   :  { %v2142_v58 = vpop.f32.mrf.mxu1  ;;  %v2254_v59 = vpop.f32.mrf.mxu0 }
 0x261   :  { %v1397_v1 = vadd.f32 %v2253_v55, %v2141_v54 }
 0x262   :  { %v2143_v2 = vpop.f32.mrf.mxu1  ;;  %v2255_v3 = vpop.f32.mrf.mxu0 }
 0x263   :  { %v1584_v5 = vmax.f32 %v1397_v1, 0.0  ;;  %v2144_v6 = vadd.f32 %v2143_v2, %v2142_v58  ;;  %v2256_v56 = vadd.f32 %v2255_v3, %v2254_v59 }
 0x264   :  { %v2145_v57 = vpop.f32.mrf.mxu1  ;;  %v2257_v62 = vpop.f32.mrf.mxu0 }
 0x265   :  { %v1982_v63 = vpack.c.bf16 %v1584_v5, %v1583_v4  ;;  %v1402_v9 = vadd.f32 %v2256_v56, %v2144_v6 }
 0x266   :  { %v2146_v7 = vpop.f32.mrf.mxu1  ;;  %v2258_v8 = vpop.f32.mrf.mxu0 }
 0x267   :  { %2034 = vst [vmem:[#allocation9 + $0x30] sm:$0xff] %v1982_v63   ;;  %v2147_v10 = vadd.f32 %v2146_v7, %v2145_v57  ;;  %v2259_v11 = vadd.f32 %v2258_v8, %v2257_v62  ;;  %v1585_v17 = vmax.f32 %v1402_v9, 0.0 }
 0x268   :  { %v2148_v12 = vpop.f32.mrf.mxu1  ;;  %v2260_v13 = vpop.f32.mrf.mxu0 }
 0x269   :  { %v1405_v14 = vadd.f32 %v2259_v11, %v2147_v10 }
 0x26a   :  { %v2149_v15 = vpop.f32.mrf.mxu1  ;;  %v2261_v16 = vpop.f32.mrf.mxu0 }
 0x26b   :  { %v1586_v18 = vmax.f32 %v1405_v14, 0.0  ;;  %v2150_v19 = vadd.f32 %v2149_v15, %v2148_v12  ;;  %v2262_v20 = vadd.f32 %v2261_v16, %v2260_v13 }
 0x26c   :  { %v2151_v21 = vpop.f32.mrf.mxu1  ;;  %v2263_v22 = vpop.f32.mrf.mxu0 }
 0x26d   :  { %v1987_v23 = vpack.c.bf16 %v1586_v18, %v1585_v17  ;;  %v1410_v26 = vadd.f32 %v2262_v20, %v2150_v19 }
 0x26e   :  { %v2152_v24 = vpop.f32.mrf.mxu1  ;;  %v2264_v25 = vpop.f32.mrf.mxu0 }
 0x26f   :  { %2035 = vst [vmem:[#allocation9 + $0x38] sm:$0xff] %v1987_v23   ;;  %v2153_v27 = vadd.f32 %v2152_v24, %v2151_v21  ;;  %v2265_v28 = vadd.f32 %v2264_v25, %v2263_v22  ;;  %v1587_v34 = vmax.f32 %v1410_v26, 0.0 }
 0x270   :  { %v2154_v29 = vpop.f32.mrf.mxu1  ;;  %v2266_v30 = vpop.f32.mrf.mxu0 }
 0x271   :  { %v1413_v31 = vadd.f32 %v2265_v28, %v2153_v27 }
 0x272   :  { %v2155_v32 = vpop.f32.mrf.mxu1  ;;  %v2267_v33 = vpop.f32.mrf.mxu0 }
 0x273   :  { %v1588_v35 = vmax.f32 %v1413_v31, 0.0  ;;  %v2156_v36 = vadd.f32 %v2155_v32, %v2154_v29  ;;  %v2268_v37 = vadd.f32 %v2267_v33, %v2266_v30 }
 0x274   :  { %v2157_v38 = vpop.f32.mrf.mxu1  ;;  %v2269_v39 = vpop.f32.mrf.mxu0 }
 0x275   :  { %v1992_v40 = vpack.c.bf16 %v1588_v35, %v1587_v34  ;;  %v1418_v44 = vadd.f32 %v2268_v37, %v2156_v36 }
 0x276   :  { %v2158_v41 = vpop.f32.mrf.mxu1  ;;  %v2270_v52 = vpop.f32.mrf.mxu0 }
 0x277   :  { %2036 = vst [vmem:[#allocation9 + $0x40] sm:$0xff] %v1992_v40   ;;  %v2159_v48 = vadd.f32 %v2158_v41, %v2157_v38  ;;  %v2271_v49 = vadd.f32 %v2270_v52, %v2269_v39  ;;  %v1589_v50 = vmax.f32 %v1418_v44, 0.0 }
 0x278   :  { %v2160_v43 = vpop.f32.mrf.mxu1  ;;  %v2272_v42 = vpop.f32.mrf.mxu0 }
 0x279   :  { %v1421_v45 = vadd.f32 %v2271_v49, %v2159_v48 }
 0x27a   :  { %v2161_v46 = vpop.f32.mrf.mxu1  ;;  %v2273_v47 = vpop.f32.mrf.mxu0 }
 0x27b   :  { %v1590_v51 = vmax.f32 %v1421_v45, 0.0  ;;  %v2162_v53 = vadd.f32 %v2161_v46, %v2160_v43  ;;  %v2274_v60 = vadd.f32 %v2273_v47, %v2272_v42 }
 0x27c   :  { %v2163_v61 = vpop.f32.mrf.mxu1  ;;  %v2275_v0 = vpop.f32.mrf.mxu0 }
 0x27d   :  { %v1997_v54 = vpack.c.bf16 %v1590_v51, %v1589_v50  ;;  %v1426_v59 = vadd.f32 %v2274_v60, %v2162_v53 }
 0x27e   :  { %v2164_v55 = vpop.f32.mrf.mxu1  ;;  %v2276_v58 = vpop.f32.mrf.mxu0 }
 0x27f   :  { %2037 = vst [vmem:[#allocation9 + $0x48] sm:$0xff] %v1997_v54   ;;  %v2165_v1 = vadd.f32 %v2164_v55, %v2163_v61  ;;  %v2277_v2 = vadd.f32 %v2276_v58, %v2275_v0  ;;  %v1591_v57 = vmax.f32 %v1426_v59, 0.0 }
 0x280   :  { %v2166_v3 = vpop.f32.mrf.mxu1  ;;  %v2278_v4 = vpop.f32.mrf.mxu0 }
 0x281   :  { %v1429_v5 = vadd.f32 %v2277_v2, %v2165_v1 }
 0x282   :  { %v2167_v6 = vpop.f32.mrf.mxu1  ;;  %v2279_v56 = vpop.f32.mrf.mxu0 }
 0x283   :  { %v1592_v62 = vmax.f32 %v1429_v5, 0.0  ;;  %v2168_v63 = vadd.f32 %v2167_v6, %v2166_v3  ;;  %v2280_v7 = vadd.f32 %v2279_v56, %v2278_v4 }
 0x284   :  { %v2169_v8 = vpop.f32.mrf.mxu1  ;;  %v2281_v9 = vpop.f32.mrf.mxu0 }
 0x285   :  { %v2002_v10 = vpack.c.bf16 %v1592_v62, %v1591_v57  ;;  %v1434_v13 = vadd.f32 %v2280_v7, %v2168_v63 }
 0x286   :  { %v2170_v11 = vpop.f32.mrf.mxu1  ;;  %v2282_v12 = vpop.f32.mrf.mxu0 }
 0x287   :  { %2038 = vst [vmem:[#allocation9 + $0x50] sm:$0xff] %v2002_v10   ;;  %v2171_v14 = vadd.f32 %v2170_v11, %v2169_v8  ;;  %v2283_v15 = vadd.f32 %v2282_v12, %v2281_v9  ;;  %v1593_v21 = vmax.f32 %v1434_v13, 0.0 }
 0x288   :  { %v2172_v16 = vpop.f32.mrf.mxu1  ;;  %v2284_v17 = vpop.f32.mrf.mxu0 }
 0x289   :  { %v1437_v18 = vadd.f32 %v2283_v15, %v2171_v14 }
 0x28a   :  { %v2173_v19 = vpop.f32.mrf.mxu1  ;;  %v2285_v20 = vpop.f32.mrf.mxu0 }
 0x28b   :  { %v1594_v22 = vmax.f32 %v1437_v18, 0.0  ;;  %v2174_v23 = vadd.f32 %v2173_v19, %v2172_v16  ;;  %v2286_v24 = vadd.f32 %v2285_v20, %v2284_v17 }
 0x28c   :  { %v2175_v25 = vpop.f32.mrf.mxu1  ;;  %v2287_v26 = vpop.f32.mrf.mxu0 }
 0x28d   :  { %v2007_v27 = vpack.c.bf16 %v1594_v22, %v1593_v21  ;;  %v1442_v30 = vadd.f32 %v2286_v24, %v2174_v23 }
 0x28e   :  { %v2176_v28 = vpop.f32.mrf.mxu1  ;;  %v2288_v29 = vpop.f32.mrf.mxu0 }
 0x28f   :  { %2039 = vst [vmem:[#allocation9 + $0x58] sm:$0xff] %v2007_v27   ;;  %v2177_v31 = vadd.f32 %v2176_v28, %v2175_v25  ;;  %v2289_v32 = vadd.f32 %v2288_v29, %v2287_v26  ;;  %v1595_v38 = vmax.f32 %v1442_v30, 0.0 }
 0x290   :  { %v2178_v33 = vpop.f32.mrf.mxu1  ;;  %v2290_v34 = vpop.f32.mrf.mxu0 }
 0x291   :  { %v1445_v35 = vadd.f32 %v2289_v32, %v2177_v31 }
 0x292   :  { %v2179_v36 = vpop.f32.mrf.mxu1  ;;  %v2291_v37 = vpop.f32.mrf.mxu0 }
 0x293   :  { %v1596_v39 = vmax.f32 %v1445_v35, 0.0  ;;  %v2180_v40 = vadd.f32 %v2179_v36, %v2178_v33  ;;  %v2292_v41 = vadd.f32 %v2291_v37, %v2290_v34 }
 0x294   :  { %v2181_v52 = vpop.f32.mrf.mxu1  ;;  %v2293_v44 = vpop.f32.mrf.mxu0 }
 0x295   :  { %v2012_v48 = vpack.c.bf16 %v1596_v39, %v1595_v38  ;;  %v1450_v42 = vadd.f32 %v2292_v41, %v2180_v40 }
 0x296   :  { %v2182_v49 = vpop.f32.mrf.mxu1  ;;  %v2294_v43 = vpop.f32.mrf.mxu0 }
 0x297   :  { %2040 = vst [vmem:[#allocation9 + $0x60] sm:$0xff] %v2012_v48   ;;  %v2183_v45 = vadd.f32 %v2182_v49, %v2181_v52  ;;  %v2295_v46 = vadd.f32 %v2294_v43, %v2293_v44  ;;  %v1597_v61 = vmax.f32 %v1450_v42, 0.0 }
 0x298   :  { %v2184_v47 = vpop.f32.mrf.mxu1  ;;  %v2296_v50 = vpop.f32.mrf.mxu0 }
 0x299   :  { %v1453_v51 = vadd.f32 %v2295_v46, %v2183_v45 }
 0x29a   :  { %v2185_v53 = vpop.f32.mrf.mxu1  ;;  %v2297_v60 = vpop.f32.mrf.mxu0 }
 0x29b   :  { %v1598_v0 = vmax.f32 %v1453_v51, 0.0  ;;  %v2186_v54 = vadd.f32 %v2185_v53, %v2184_v47  ;;  %v2298_v55 = vadd.f32 %v2297_v60, %v2296_v50 }
 0x29c   :  { %v2187_v58 = vpop.f32.mrf.mxu1  ;;  %v2299_v59 = vpop.f32.mrf.mxu0 }
 0x29d   :  { %v2017_v1 = vpack.c.bf16 %v1598_v0, %v1597_v61  ;;  %v1458_v4 = vadd.f32 %v2298_v55, %v2186_v54 }
 0x29e   :  { %v2188_v2 = vpop.f32.mrf.mxu1  ;;  %v2300_v3 = vpop.f32.mrf.mxu0 }
 0x29f   :  { %2041 = vst [vmem:[#allocation9 + $0x68] sm:$0xff] %v2017_v1   ;;  %v2189_v5 = vadd.f32 %v2188_v2, %v2187_v58  ;;  %v2301_v6 = vadd.f32 %v2300_v3, %v2299_v59  ;;  %v1599_v8 = vmax.f32 %v1458_v4, 0.0 }
 0x2a0   :  { %v2190_v56 = vpop.f32.mrf.mxu1  ;;  %v2302_v57 = vpop.f32.mrf.mxu0 }
 0x2a1   :  { %v1461_v62 = vadd.f32 %v2301_v6, %v2189_v5 }
 0x2a2   :  { %v2191_v63 = vpop.f32.mrf.mxu1  ;;  %v2303_v7 = vpop.f32.mrf.mxu0 }
 0x2a3   :  { %v1600_v9 = vmax.f32 %v1461_v62, 0.0  ;;  %v2192_v10 = vadd.f32 %v2191_v63, %v2190_v56  ;;  %v2304_v11 = vadd.f32 %v2303_v7, %v2302_v57 }
 0x2a4   :  { %v2193_v12 = vpop.f32.mrf.mxu1  ;;  %v2305_v13 = vpop.f32.mrf.mxu0 }
 0x2a5   :  { %v2022_v14 = vpack.c.bf16 %v1600_v9, %v1599_v8  ;;  %v1466_v17 = vadd.f32 %v2304_v11, %v2192_v10 }
 0x2a6   :  { %v2194_v15 = vpop.f32.mrf.mxu1  ;;  %v2306_v16 = vpop.f32.mrf.mxu0 }
 0x2a7   :  { %2042 = vst [vmem:[#allocation9 + $0x70] sm:$0xff] %v2022_v14   ;;  %v2195_v18 = vadd.f32 %v2194_v15, %v2193_v12  ;;  %v2307_v19 = vadd.f32 %v2306_v16, %v2305_v13  ;;  %v1601_v21 = vmax.f32 %v1466_v17, 0.0 }
 0x2a9   :  { %v1469_v20 = vadd.f32 %v2307_v19, %v2195_v18 }
 0x2ab   :  { %v1602_v22 = vmax.f32 %v1469_v20, 0.0 }
 0x2ad   :  { %v2027_v23 = vpack.c.bf16 %v1602_v22, %v1601_v21 }
 0x2af   :  { %2043 = vst [vmem:[#allocation9 + $0x78] sm:$0xff] %v2027_v23  }
 0x2b0   :  { %2619 = shalt.err (!%p2616_p5)
}
 0x2b1   :  { %1774 = dma.vmem_to_hbm [thread:$0]  %s1769_s2, 2048, %s2806_s3, [#allocation5], %s2635_s15, %s2635_s15, %s2636_s16  }
 0x2b2   :  { %2632 = dma.done.wait [#allocation5], 2048  }
 0x2b3   :  { %2633 = vsyncadd [#allocation5], 4294965248 }
 0x2b4   :  { %1778 = vsyncpa [#allocation4], 1 }
 0x2b5   :  { %1779 = vsyncpa [#allocation7], 1 }
 0x2b6   :  { %1780 = vsyncpa [#allocation5], 1 }

</bundles_post_ra>
